<compile_context>
chip_gen: v7x
topology: tpu7x:2x2x1
jax: 0.10.0
libtpu: 0.0.40
codegen_flags: <defaults>
</compile_context>

<pallas_src>
import jax
import jax.numpy as jnp
from jax import lax
from jax.experimental import pallas as pl
from jax.experimental.pallas import tpu as pltpu


def deepset_kernel(
    x_ref,            # (1, N, M, C)   one dataset per grid step
    ym_ref,           # (1, 1, META)   meta features of this dataset
    ab0_ref,          # (C, 2*H0)      [alpha0 | beta0]
    bias0_ref,        # (1, H0)
    bi0_ref,          # (H0, H0)       inv_0 beta
    biasi0_ref,       # (1, H0)
    ab1_ref,          # (H0, 4*H1)     [alpha1 | beta1]
    bias1_ref,        # (1, 2*H1)
    bi1_ref,          # (2*H1, 4*H1)   inv_1 beta
    biasi1_ref,       # (1, 4*H1)
    w1a_ref,          # (4*H1, 2*P)    Linear1 (BN1 folded), deep-set slice
    w1b_ref,          # (META, 2*P)    Linear1 (BN1 folded), meta slice
    c1_ref,           # (1, 2*P)
    w2_ref,           # (2*P, P)       Linear2 (BN2 folded)
    c2_ref,           # (1, P)
    w3_ref,           # (P, OUT_PAD)   Linear3, zero-padded to lane width
    c3_ref,           # (1, OUT_PAD)
    out_ref,          # (1, 1, OUT_PAD)
):
    x = x_ref[0]                                   # (N, M, C)
    ab0 = ab0_ref[...]                             # (C, 2*H0)
    C = ab0.shape[0]
    H0 = bias0_ref.shape[-1]
    H1x2 = bias1_ref.shape[-1]

    # ---- equiv_0 (alpha|beta fused).  K = C is tiny, so lower the contraction to
    #      VPU broadcast-FMAs and skip the MXU entirely for this layer. ----
    t0 = x[..., 0:1] * ab0[0:1, :]
    for c in range(1, C):                          # static, unrolled
        t0 = t0 + x[..., c:c + 1] * ab0[c:c + 1, :]          # (N, M, 2*H0)
    y0 = jnp.maximum(
        t0[..., :H0]
        + jnp.mean(t0[..., H0:], axis=1, keepdims=True)      # mean over instances M
        + bias0_ref[...],
        0.0)                                                 # (N, M, H0)

    # ---- inv_0: mean over M, then (N, H0) @ (H0, H0) ----
    z0 = jnp.dot(jnp.mean(y0, axis=1), bi0_ref[...],
                 preferred_element_type=jnp.float32) + biasi0_ref[...]     # (N, H0)

    # ---- equiv_1 (alpha|beta fused into one MXU matmul) ----
    t1 = jnp.dot(z0, ab1_ref[...], preferred_element_type=jnp.float32)     # (N, 4*H1)
    y1 = jnp.maximum(
        t1[:, :H1x2]
        + jnp.mean(t1[:, H1x2:], axis=0, keepdims=True)      # mean over features N
        + bias1_ref[...],
        0.0)                                                 # (N, 2*H1)

    # ---- inv_1 ----
    z1 = jnp.dot(jnp.mean(y1, axis=0, keepdims=True), bi1_ref[...],
                 preferred_element_type=jnp.float32) + biasi1_ref[...]     # (1, 4*H1)

    # ---- classifier.  hstack([z1, y_meta]) @ W1 is computed as a split matmul so no
    #      in-kernel concat is needed; BN1/BN2 are folded into W/c; Dropout = identity.
    ym = ym_ref[0]                                                         # (1, META)
    a = (jnp.dot(z1, w1a_ref[...], preferred_element_type=jnp.float32)
         + jnp.dot(ym, w1b_ref[...], preferred_element_type=jnp.float32)
         + c1_ref[...])
    a = jnp.maximum(a, 0.0)
    b = jnp.maximum(
        jnp.dot(a, w2_ref[...], preferred_element_type=jnp.float32) + c2_ref[...],
        0.0)
    out_ref[0] = (jnp.dot(b, w3_ref[...], preferred_element_type=jnp.float32)
                  + c3_ref[...])


def deepset_forward(X, y, params, *, eps=1e-5):
    """X: (B, N, M, C) float32; y: (B, META) float32 meta features."""
    B, N, M, C = X.shape
    H1x4 = params["biasi1"].shape[-1]          # 4 * hidden_size_1
    META = y.shape[-1]
    OUT = params["w3"].shape[-1]
    OUT_PAD = 128                              # lane-dense output slab (sliced below)
    f32 = jnp.float32

    # ---- host-side algebraic folding (exact, inference mode) ----
    ab0 = jnp.concatenate([params["a0"], params["b0"]], axis=1)      # (C, 2*H0)
    ab1 = jnp.concatenate([params["a1"], params["b1"]], axis=1)      # (H0, 4*H1)

    s1 = params["g1"] * lax.rsqrt(params["rv1"] + eps)               # fold BN1 into Linear1
    w1f = params["w1"] * s1
    c1f = (params["c1"] - params["rm1"]) * s1 + params["be1"]
    w1a, w1b = w1f[:H1x4], w1f[H1x4:]                                # split: deep-set | meta

    s2 = params["g2"] * lax.rsqrt(params["rv2"] + eps)               # fold BN2 into Linear2
    w2f = params["w2"] * s2
    c2f = (params["c2"] - params["rm2"]) * s2 + params["be2"]

    w3p = jnp.zeros((params["w3"].shape[0], OUT_PAD), f32).at[:, :OUT].set(params["w3"])
    c3p = jnp.zeros((1, OUT_PAD), f32).at[:, :OUT].set(params["c3"])

    ym = y.reshape(B, 1, META).astype(f32)

    weights = [ab0, params["bias0"], params["bi0"], params["biasi0"],
               ab1, params["bias1"], params["bi1"], params["biasi1"],
               w1a, w1b, c1f, w2f, c2f, w3p, c3p]
    weights = [w.astype(f32) for w in weights]

    def resident(arr):  # full-array block -> stays VMEM-resident across grid steps
        nd = arr.ndim
        return pl.BlockSpec(arr.shape, lambda i, _nd=nd: (0,) * _nd)

    grid_spec = pltpu.PrefetchScalarGridSpec(
        num_scalar_prefetch=0,
        grid=(B,),
        in_specs=[pl.BlockSpec((1, N, M, C), lambda i: (i, 0, 0, 0)),   # X tile (pipelined)
                  pl.BlockSpec((1, 1, META), lambda i: (i, 0, 0))]      # meta tile
                 + [resident(w) for w in weights],
        out_specs=pl.BlockSpec((1, 1, OUT_PAD), lambda i: (i, 0, 0)),
    )

    out_padded = pl.pallas_call(
        deepset_kernel,
        out_shape=jax.ShapeDtypeStruct((B, 1, OUT_PAD), f32),
        grid_spec=grid_spec,
        compiler_params=pltpu.CompilerParams(
            dimension_semantics=("parallel",)),   # v7x: shard batch across both TCs
    )(X.astype(f32), ym, *weights)

    return out_padded[:, 0, :OUT]


def reference_forward(X, y, params, *, eps=1e-5):
    """Pure-JAX reference (unfused) with identical semantics."""
    B, N, M, C = X.shape
    x = X.reshape(B * N, M, C)
    h = jnp.einsum('smc,ch->smh', x, params["a0"]) + (
        jnp.mean(x, axis=1) @ params["b0"] + params["bias0"])[:, None, :]
    h = jnp.maximum(h, 0.0)
    z = jnp.mean(h, axis=1) @ params["bi0"] + params["biasi0"]
    z = z.reshape(B, N, -1)
    h1 = jnp.einsum('bnh,hk->bnk', z, params["a1"]) + (
        jnp.mean(z, axis=1) @ params["b1"] + params["bias1"])[:, None, :]
    h1 = jnp.maximum(h1, 0.0)
    z1 = jnp.mean(h1, axis=1) @ params["bi1"] + params["biasi1"]
    zc = jnp.concatenate([z1, y], axis=1)
    a = zc @ params["w1"] + params["c1"]
    a = (a - params["rm1"]) * lax.rsqrt(params["rv1"] + eps) * params["g1"] + params["be1"]
    a = jnp.maximum(a, 0.0)
    b = a @ params["w2"] + params["c2"]
    b = (b - params["rm2"]) * lax.rsqrt(params["rv2"] + eps) * params["g2"] + params["be2"]
    b = jnp.maximum(b, 0.0)
    return b @ params["w3"] + params["c3"]


def make_params(key, in_channels, h0, h1, predlast, out_classes, meta_size):
    """Deterministic synthetic parameters (Linear weights stored pre-transposed as (in, out))."""
    keys = iter(jax.random.split(key, 32))

    def w(shape, scale=0.1):
        return (scale * jax.random.normal(next(keys), shape)).astype(jnp.float32)

    p = {}
    # equiv_0 / inv_0
    p["a0"] = w((in_channels, h0)); p["b0"] = w((in_channels, h0)); p["bias0"] = w((1, h0))
    p["bi0"] = w((h0, h0)); p["biasi0"] = w((1, h0))
    # equiv_1 / inv_1
    p["a1"] = w((h0, 2 * h1)); p["b1"] = w((h0, 2 * h1)); p["bias1"] = w((1, 2 * h1))
    p["bi1"] = w((2 * h1, 4 * h1)); p["biasi1"] = w((1, 4 * h1))
    # classifier (Linear1 consumes hstack([deep-set features, meta]))
    p["w1"] = w((4 * h1 + meta_size, 2 * predlast)); p["c1"] = w((1, 2 * predlast))
    p["g1"] = w((1, 2 * predlast), 1.0); p["be1"] = w((1, 2 * predlast))
    p["rm1"] = w((1, 2 * predlast))
    p["rv1"] = (0.5 + jax.random.uniform(next(keys), (1, 2 * predlast))).astype(jnp.float32)
    p["w2"] = w((2 * predlast, predlast)); p["c2"] = w((1, predlast))
    p["g2"] = w((1, predlast), 1.0); p["be2"] = w((1, predlast))
    p["rm2"] = w((1, predlast))
    p["rv2"] = (0.5 + jax.random.uniform(next(keys), (1, predlast))).astype(jnp.float32)
    p["w3"] = w((predlast, out_classes)); p["c3"] = w((1, out_classes))
    return p


if __name__ == "__main__":
    # Small shapes consistent with the module (in_channels=2, meta_size=27, out_classes=3):
    B, N, M, C = 2, 8, 16, 2           # batch, features (outer set), instances (inner set), channels
    H0, H1, PRED, OUT = 32, 32, 32, 3  # hidden_size_0, hidden_size_1, predlast_hidden_size, out_classes
    META = 27

    key = jax.random.PRNGKey(0)
    kx, ky, kp = jax.random.split(key, 3)
    X = jax.random.normal(kx, (B, N, M, C), dtype=jnp.float32)
    y = jax.random.normal(ky, (B, META), dtype=jnp.float32)
    params = make_params(kp, C, H0, H1, PRED, OUT, META)

    out = jax.block_until_ready(deepset_forward(X, y, params))
    assert out.shape == (B, OUT) and out.dtype == jnp.float32

    ref = jax.block_until_ready(reference_forward(X, y, params))
    assert jnp.allclose(out, ref, rtol=1e-4, atol=1e-4), (out, ref)
    print("KERNEL_OK")
</pallas_src>

<mosaic_0001>
module attributes {stable_mosaic.version = 11 : i64} {
  func.func @deepset_kernel(%arg0: i32, %arg1: memref<1x8x16x2xf32, #tpu.memory_space<vmem>>, %arg2: memref<1x1x27xf32, #tpu.memory_space<vmem>>, %arg3: memref<2x64xf32, #tpu.memory_space<vmem>>, %arg4: memref<1x32xf32, #tpu.memory_space<vmem>>, %arg5: memref<32x32xf32, #tpu.memory_space<vmem>>, %arg6: memref<1x32xf32, #tpu.memory_space<vmem>>, %arg7: memref<32x128xf32, #tpu.memory_space<vmem>>, %arg8: memref<1x64xf32, #tpu.memory_space<vmem>>, %arg9: memref<64x128xf32, #tpu.memory_space<vmem>>, %arg10: memref<1x128xf32, #tpu.memory_space<vmem>>, %arg11: memref<128x64xf32, #tpu.memory_space<vmem>>, %arg12: memref<27x64xf32, #tpu.memory_space<vmem>>, %arg13: memref<1x64xf32, #tpu.memory_space<vmem>>, %arg14: memref<64x32xf32, #tpu.memory_space<vmem>>, %arg15: memref<1x32xf32, #tpu.memory_space<vmem>>, %arg16: memref<32x128xf32, #tpu.memory_space<vmem>>, %arg17: memref<1x128xf32, #tpu.memory_space<vmem>>, %arg18: memref<1x1x128xf32, #tpu.memory_space<vmem>>) attributes {dimension_semantics = [#tpu.dimension_semantics<parallel>], iteration_bounds = array<i64: 2>, scalar_prefetch = 0 : i64, scratch_operands = 0 : i64, tpu.core_type = #tpu.core_type<tc>, window_params = [{transform_indices = @transform_0, window_bounds = array<i64: 1, 8, 16, 2>}, {transform_indices = @transform_1, window_bounds = array<i64: 1, 1, 27>}, {pipeline_mode = #tpu.pipeline_mode<synchronous>, transform_indices = @transform_2, window_bounds = array<i64: 2, 64>}, {pipeline_mode = #tpu.pipeline_mode<synchronous>, transform_indices = @transform_3, window_bounds = array<i64: 1, 32>}, {pipeline_mode = #tpu.pipeline_mode<synchronous>, transform_indices = @transform_4, window_bounds = array<i64: 32, 32>}, {pipeline_mode = #tpu.pipeline_mode<synchronous>, transform_indices = @transform_5, window_bounds = array<i64: 1, 32>}, {pipeline_mode = #tpu.pipeline_mode<synchronous>, transform_indices = @transform_6, window_bounds = array<i64: 32, 128>}, {pipeline_mode = #tpu.pipeline_mode<synchronous>, transform_indices = @transform_7, window_bounds = array<i64: 1, 64>}, {pipeline_mode = #tpu.pipeline_mode<synchronous>, transform_indices = @transform_8, window_bounds = array<i64: 64, 128>}, {pipeline_mode = #tpu.pipeline_mode<synchronous>, transform_indices = @transform_9, window_bounds = array<i64: 1, 128>}, {pipeline_mode = #tpu.pipeline_mode<synchronous>, transform_indices = @transform_10, window_bounds = array<i64: 128, 64>}, {pipeline_mode = #tpu.pipeline_mode<synchronous>, transform_indices = @transform_11, window_bounds = array<i64: 27, 64>}, {pipeline_mode = #tpu.pipeline_mode<synchronous>, transform_indices = @transform_12, window_bounds = array<i64: 1, 64>}, {pipeline_mode = #tpu.pipeline_mode<synchronous>, transform_indices = @transform_13, window_bounds = array<i64: 64, 32>}, {pipeline_mode = #tpu.pipeline_mode<synchronous>, transform_indices = @transform_14, window_bounds = array<i64: 1, 32>}, {pipeline_mode = #tpu.pipeline_mode<synchronous>, transform_indices = @transform_15, window_bounds = array<i64: 32, 128>}, {pipeline_mode = #tpu.pipeline_mode<synchronous>, transform_indices = @transform_16, window_bounds = array<i64: 1, 128>}, {transform_indices = @transform_17, window_bounds = array<i64: 1, 1, 128>}]} {
    %c0 = arith.constant 0 : index
    %c0_0 = arith.constant 0 : index
    %c0_1 = arith.constant 0 : index
    %c0_2 = arith.constant 0 : index
    %0 = vector.load %arg1[%c0, %c0_0, %c0_1, %c0_2] : memref<1x8x16x2xf32, #tpu.memory_space<vmem>>, vector<1x8x16x2xf32>
    %1 = vector.shape_cast %0 : vector<1x8x16x2xf32> to vector<8x16x2xf32>
    %c0_3 = arith.constant 0 : index
    %c0_4 = arith.constant 0 : index
    %2 = vector.load %arg3[%c0_3, %c0_4] : memref<2x64xf32, #tpu.memory_space<vmem>>, vector<2x64xf32>
    %3 = vector.extract_strided_slice %1 {offsets = [0, 0, 0], sizes = [8, 16, 1], strides = [1, 1, 1]} : vector<8x16x2xf32> to vector<8x16x1xf32>
    %4 = vector.extract_strided_slice %2 {offsets = [0, 0], sizes = [1, 64], strides = [1, 1]} : vector<2x64xf32> to vector<1x64xf32>
    %5 = vector.shape_cast %4 : vector<1x64xf32> to vector<1x1x64xf32>
    %6 = vector.broadcast %3 : vector<8x16x1xf32> to vector<8x16x64xf32>
    %7 = vector.broadcast %5 : vector<1x1x64xf32> to vector<8x16x64xf32>
    %8 = arith.mulf %6, %7 : vector<8x16x64xf32>
    %9 = vector.extract_strided_slice %1 {offsets = [0, 0, 1], sizes = [8, 16, 1], strides = [1, 1, 1]} : vector<8x16x2xf32> to vector<8x16x1xf32>
    %10 = vector.extract_strided_slice %2 {offsets = [1, 0], sizes = [1, 64], strides = [1, 1]} : vector<2x64xf32> to vector<1x64xf32>
    %11 = vector.shape_cast %10 : vector<1x64xf32> to vector<1x1x64xf32>
    %12 = vector.broadcast %9 : vector<8x16x1xf32> to vector<8x16x64xf32>
    %13 = vector.broadcast %11 : vector<1x1x64xf32> to vector<8x16x64xf32>
    %14 = arith.mulf %12, %13 : vector<8x16x64xf32>
    %15 = arith.addf %8, %14 : vector<8x16x64xf32>
    %16 = vector.extract_strided_slice %15 {offsets = [0, 0, 0], sizes = [8, 16, 32], strides = [1, 1, 1]} : vector<8x16x64xf32> to vector<8x16x32xf32>
    %17 = vector.extract_strided_slice %15 {offsets = [0, 0, 32], sizes = [8, 16, 32], strides = [1, 1, 1]} : vector<8x16x64xf32> to vector<8x16x32xf32>
    %cst = arith.constant dense<0.000000e+00> : vector<8x32xf32>
    %18 = vector.multi_reduction <add>, %17, %cst [1] : vector<8x16x32xf32> to vector<8x32xf32>
    %19 = vector.shape_cast %18 : vector<8x32xf32> to vector<8x1x32xf32>
    %cst_5 = arith.constant 1.600000e+01 : f32
    %20 = vector.broadcast %cst_5 : f32 to vector<8x1x32xf32>
    %21 = arith.divf %19, %20 : vector<8x1x32xf32>
    %22 = vector.broadcast %21 : vector<8x1x32xf32> to vector<8x16x32xf32>
    %23 = arith.addf %16, %22 : vector<8x16x32xf32>
    %c0_6 = arith.constant 0 : index
    %c0_7 = arith.constant 0 : index
    %24 = vector.load %arg4[%c0_6, %c0_7] : memref<1x32xf32, #tpu.memory_space<vmem>>, vector<1x32xf32>
    %25 = vector.shape_cast %24 : vector<1x32xf32> to vector<1x1x32xf32>
    %26 = vector.broadcast %25 : vector<1x1x32xf32> to vector<8x16x32xf32>
    %27 = arith.addf %23, %26 : vector<8x16x32xf32>
    %cst_8 = arith.constant 0.000000e+00 : f32
    %28 = vector.broadcast %cst_8 : f32 to vector<8x16x32xf32>
    %29 = arith.maximumf %27, %28 : vector<8x16x32xf32>
    %cst_9 = arith.constant dense<0.000000e+00> : vector<8x32xf32>
    %30 = vector.multi_reduction <add>, %29, %cst_9 [1] : vector<8x16x32xf32> to vector<8x32xf32>
    %cst_10 = arith.constant 1.600000e+01 : f32
    %31 = vector.broadcast %cst_10 : f32 to vector<8x32xf32>
    %32 = arith.divf %30, %31 : vector<8x32xf32>
    %c0_11 = arith.constant 0 : index
    %c0_12 = arith.constant 0 : index
    %33 = vector.load %arg5[%c0_11, %c0_12] : memref<32x32xf32, #tpu.memory_space<vmem>>, vector<32x32xf32>
    %cst_13 = arith.constant dense<0.000000e+00> : vector<8x32xf32>
    %34 = tpu.matmul %32, %33, %cst_13 {dimension_numbers = #tpu.dot_dimension_numbers<[1], [0], [0], [1], [0, 0, 1, 1], [], []>} : vector<8x32xf32>, vector<32x32xf32>, vector<8x32xf32> -> vector<8x32xf32>
    %c0_14 = arith.constant 0 : index
    %c0_15 = arith.constant 0 : index
    %35 = vector.load %arg6[%c0_14, %c0_15] : memref<1x32xf32, #tpu.memory_space<vmem>>, vector<1x32xf32>
    %36 = vector.broadcast %35 : vector<1x32xf32> to vector<8x32xf32>
    %37 = arith.addf %34, %36 : vector<8x32xf32>
    %c0_16 = arith.constant 0 : index
    %c0_17 = arith.constant 0 : index
    %38 = vector.load %arg7[%c0_16, %c0_17] : memref<32x128xf32, #tpu.memory_space<vmem>>, vector<32x128xf32>
    %cst_18 = arith.constant dense<0.000000e+00> : vector<8x128xf32>
    %39 = tpu.matmul %37, %38, %cst_18 {dimension_numbers = #tpu.dot_dimension_numbers<[1], [0], [0], [1], [0, 0, 1, 1], [], []>} : vector<8x32xf32>, vector<32x128xf32>, vector<8x128xf32> -> vector<8x128xf32>
    %40 = vector.extract_strided_slice %39 {offsets = [0, 0], sizes = [8, 64], strides = [1, 1]} : vector<8x128xf32> to vector<8x64xf32>
    %41 = vector.extract_strided_slice %39 {offsets = [0, 64], sizes = [8, 64], strides = [1, 1]} : vector<8x128xf32> to vector<8x64xf32>
    %cst_19 = arith.constant dense<0.000000e+00> : vector<64xf32>
    %42 = vector.multi_reduction <add>, %41, %cst_19 [0] : vector<8x64xf32> to vector<64xf32>
    %43 = vector.shape_cast %42 : vector<64xf32> to vector<1x64xf32>
    %cst_20 = arith.constant 8.000000e+00 : f32
    %44 = vector.broadcast %cst_20 : f32 to vector<1x64xf32>
    %45 = arith.divf %43, %44 : vector<1x64xf32>
    %46 = vector.broadcast %45 : vector<1x64xf32> to vector<8x64xf32>
    %47 = arith.addf %40, %46 : vector<8x64xf32>
    %c0_21 = arith.constant 0 : index
    %c0_22 = arith.constant 0 : index
    %48 = vector.load %arg8[%c0_21, %c0_22] : memref<1x64xf32, #tpu.memory_space<vmem>>, vector<1x64xf32>
    %49 = vector.broadcast %48 : vector<1x64xf32> to vector<8x64xf32>
    %50 = arith.addf %47, %49 : vector<8x64xf32>
    %cst_23 = arith.constant 0.000000e+00 : f32
    %51 = vector.broadcast %cst_23 : f32 to vector<8x64xf32>
    %52 = arith.maximumf %50, %51 : vector<8x64xf32>
    %cst_24 = arith.constant dense<0.000000e+00> : vector<64xf32>
    %53 = vector.multi_reduction <add>, %52, %cst_24 [0] : vector<8x64xf32> to vector<64xf32>
    %54 = vector.shape_cast %53 : vector<64xf32> to vector<1x64xf32>
    %cst_25 = arith.constant 8.000000e+00 : f32
    %55 = vector.broadcast %cst_25 : f32 to vector<1x64xf32>
    %56 = arith.divf %54, %55 : vector<1x64xf32>
    %c0_26 = arith.constant 0 : index
    %c0_27 = arith.constant 0 : index
    %57 = vector.load %arg9[%c0_26, %c0_27] : memref<64x128xf32, #tpu.memory_space<vmem>>, vector<64x128xf32>
    %cst_28 = arith.constant dense<0.000000e+00> : vector<1x128xf32>
    %58 = tpu.matmul %56, %57, %cst_28 {dimension_numbers = #tpu.dot_dimension_numbers<[1], [0], [0], [1], [0, 0, 1, 1], [], []>} : vector<1x64xf32>, vector<64x128xf32>, vector<1x128xf32> -> vector<1x128xf32>
    %c0_29 = arith.constant 0 : index
    %c0_30 = arith.constant 0 : index
    %59 = vector.load %arg10[%c0_29, %c0_30] : memref<1x128xf32, #tpu.memory_space<vmem>>, vector<1x128xf32>
    %60 = arith.addf %58, %59 : vector<1x128xf32>
    %c0_31 = arith.constant 0 : index
    %c0_32 = arith.constant 0 : index
    %c0_33 = arith.constant 0 : index
    %61 = vector.load %arg2[%c0_31, %c0_32, %c0_33] : memref<1x1x27xf32, #tpu.memory_space<vmem>>, vector<1x1x27xf32>
    %62 = vector.shape_cast %61 : vector<1x1x27xf32> to vector<1x27xf32>
    %c0_34 = arith.constant 0 : index
    %c0_35 = arith.constant 0 : index
    %63 = vector.load %arg11[%c0_34, %c0_35] : memref<128x64xf32, #tpu.memory_space<vmem>>, vector<128x64xf32>
    %cst_36 = arith.constant dense<0.000000e+00> : vector<1x64xf32>
    %64 = tpu.matmul %60, %63, %cst_36 {dimension_numbers = #tpu.dot_dimension_numbers<[1], [0], [0], [1], [0, 0, 1, 1], [], []>} : vector<1x128xf32>, vector<128x64xf32>, vector<1x64xf32> -> vector<1x64xf32>
    %c0_37 = arith.constant 0 : index
    %c0_38 = arith.constant 0 : index
    %65 = vector.load %arg12[%c0_37, %c0_38] : memref<27x64xf32, #tpu.memory_space<vmem>>, vector<27x64xf32>
    %cst_39 = arith.constant dense<0.000000e+00> : vector<1x64xf32>
    %66 = tpu.matmul %62, %65, %cst_39 {dimension_numbers = #tpu.dot_dimension_numbers<[1], [0], [0], [1], [0, 0, 1, 1], [], []>} : vector<1x27xf32>, vector<27x64xf32>, vector<1x64xf32> -> vector<1x64xf32>
    %67 = arith.addf %64, %66 : vector<1x64xf32>
    %c0_40 = arith.constant 0 : index
    %c0_41 = arith.constant 0 : index
    %68 = vector.load %arg13[%c0_40, %c0_41] : memref<1x64xf32, #tpu.memory_space<vmem>>, vector<1x64xf32>
    %69 = arith.addf %67, %68 : vector<1x64xf32>
    %cst_42 = arith.constant 0.000000e+00 : f32
    %70 = vector.broadcast %cst_42 : f32 to vector<1x64xf32>
    %71 = arith.maximumf %69, %70 : vector<1x64xf32>
    %c0_43 = arith.constant 0 : index
    %c0_44 = arith.constant 0 : index
    %72 = vector.load %arg14[%c0_43, %c0_44] : memref<64x32xf32, #tpu.memory_space<vmem>>, vector<64x32xf32>
    %cst_45 = arith.constant dense<0.000000e+00> : vector<1x32xf32>
    %73 = tpu.matmul %71, %72, %cst_45 {dimension_numbers = #tpu.dot_dimension_numbers<[1], [0], [0], [1], [0, 0, 1, 1], [], []>} : vector<1x64xf32>, vector<64x32xf32>, vector<1x32xf32> -> vector<1x32xf32>
    %c0_46 = arith.constant 0 : index
    %c0_47 = arith.constant 0 : index
    %74 = vector.load %arg15[%c0_46, %c0_47] : memref<1x32xf32, #tpu.memory_space<vmem>>, vector<1x32xf32>
    %75 = arith.addf %73, %74 : vector<1x32xf32>
    %cst_48 = arith.constant 0.000000e+00 : f32
    %76 = vector.broadcast %cst_48 : f32 to vector<1x32xf32>
    %77 = arith.maximumf %75, %76 : vector<1x32xf32>
    %c0_49 = arith.constant 0 : index
    %c0_50 = arith.constant 0 : index
    %78 = vector.load %arg16[%c0_49, %c0_50] : memref<32x128xf32, #tpu.memory_space<vmem>>, vector<32x128xf32>
    %cst_51 = arith.constant dense<0.000000e+00> : vector<1x128xf32>
    %79 = tpu.matmul %77, %78, %cst_51 {dimension_numbers = #tpu.dot_dimension_numbers<[1], [0], [0], [1], [0, 0, 1, 1], [], []>} : vector<1x32xf32>, vector<32x128xf32>, vector<1x128xf32> -> vector<1x128xf32>
    %c0_52 = arith.constant 0 : index
    %c0_53 = arith.constant 0 : index
    %80 = vector.load %arg17[%c0_52, %c0_53] : memref<1x128xf32, #tpu.memory_space<vmem>>, vector<1x128xf32>
    %81 = arith.addf %79, %80 : vector<1x128xf32>
    %c0_54 = arith.constant 0 : index
    %c0_55 = arith.constant 0 : index
    %c0_56 = arith.constant 0 : index
    %82 = vector.load %arg18[%c0_54, %c0_55, %c0_56] : memref<1x1x128xf32, #tpu.memory_space<vmem>>, vector<1x1x128xf32>
    %83 = vector.shape_cast %82 : vector<1x1x128xf32> to vector<1x128xf32>
    %84 = vector.shape_cast %81 : vector<1x128xf32> to vector<1x1x128xf32>
    tpu.vector_store %arg18[%c0_54, %c0_55, %c0_56], %84 {strides = array<i32>} : memref<1x1x128xf32, #tpu.memory_space<vmem>>, vector<1x1x128xf32>,
    return
  }
  func.func @transform_0(%arg0: i32) -> (i32, i32, i32, i32) {
    %c0_i32 = arith.constant 0 : i32
    %c0_i32_0 = arith.constant 0 : i32
    %c0_i32_1 = arith.constant 0 : i32
    %c0_i32_2 = arith.constant 0 : i32
    return %arg0, %c0_i32, %c0_i32_0, %c0_i32_1 : i32, i32, i32, i32
  }
  func.func @transform_1(%arg0: i32) -> (i32, i32, i32) {
    %c0_i32 = arith.constant 0 : i32
    %c0_i32_0 = arith.constant 0 : i32
    %c0_i32_1 = arith.constant 0 : i32
    return %arg0, %c0_i32, %c0_i32_0 : i32, i32, i32
  }
  func.func @transform_2(%arg0: i32) -> (i32, i32) {
    %c0_i32 = arith.constant 0 : i32
    %c0_i32_0 = arith.constant 0 : i32
    %c0_i32_1 = arith.constant 0 : i32
    return %c0_i32, %c0_i32_0 : i32, i32
  }
  func.func @transform_3(%arg0: i32) -> (i32, i32) {
    %c0_i32 = arith.constant 0 : i32
    %c0_i32_0 = arith.constant 0 : i32
    %c0_i32_1 = arith.constant 0 : i32
    return %c0_i32, %c0_i32_0 : i32, i32
  }
  func.func @transform_4(%arg0: i32) -> (i32, i32) {
    %c0_i32 = arith.constant 0 : i32
    %c0_i32_0 = arith.constant 0 : i32
    %c0_i32_1 = arith.constant 0 : i32
    return %c0_i32, %c0_i32_0 : i32, i32
  }
  func.func @transform_5(%arg0: i32) -> (i32, i32) {
    %c0_i32 = arith.constant 0 : i32
    %c0_i32_0 = arith.constant 0 : i32
    %c0_i32_1 = arith.constant 0 : i32
    return %c0_i32, %c0_i32_0 : i32, i32
  }
  func.func @transform_6(%arg0: i32) -> (i32, i32) {
    %c0_i32 = arith.constant 0 : i32
    %c0_i32_0 = arith.constant 0 : i32
    %c0_i32_1 = arith.constant 0 : i32
    return %c0_i32, %c0_i32_0 : i32, i32
  }
  func.func @transform_7(%arg0: i32) -> (i32, i32) {
    %c0_i32 = arith.constant 0 : i32
    %c0_i32_0 = arith.constant 0 : i32
    %c0_i32_1 = arith.constant 0 : i32
    return %c0_i32, %c0_i32_0 : i32, i32
  }
  func.func @transform_8(%arg0: i32) -> (i32, i32) {
    %c0_i32 = arith.constant 0 : i32
    %c0_i32_0 = arith.constant 0 : i32
    %c0_i32_1 = arith.constant 0 : i32
    return %c0_i32, %c0_i32_0 : i32, i32
  }
  func.func @transform_9(%arg0: i32) -> (i32, i32) {
    %c0_i32 = arith.constant 0 : i32
    %c0_i32_0 = arith.constant 0 : i32
    %c0_i32_1 = arith.constant 0 : i32
    return %c0_i32, %c0_i32_0 : i32, i32
  }
  func.func @transform_10(%arg0: i32) -> (i32, i32) {
    %c0_i32 = arith.constant 0 : i32
    %c0_i32_0 = arith.constant 0 : i32
    %c0_i32_1 = arith.constant 0 : i32
    return %c0_i32, %c0_i32_0 : i32, i32
  }
  func.func @transform_11(%arg0: i32) -> (i32, i32) {
    %c0_i32 = arith.constant 0 : i32
    %c0_i32_0 = arith.constant 0 : i32
    %c0_i32_1 = arith.constant 0 : i32
    return %c0_i32, %c0_i32_0 : i32, i32
  }
  func.func @transform_12(%arg0: i32) -> (i32, i32) {
    %c0_i32 = arith.constant 0 : i32
    %c0_i32_0 = arith.constant 0 : i32
    %c0_i32_1 = arith.constant 0 : i32
    return %c0_i32, %c0_i32_0 : i32, i32
  }
  func.func @transform_13(%arg0: i32) -> (i32, i32) {
    %c0_i32 = arith.constant 0 : i32
    %c0_i32_0 = arith.constant 0 : i32
    %c0_i32_1 = arith.constant 0 : i32
    return %c0_i32, %c0_i32_0 : i32, i32
  }
  func.func @transform_14(%arg0: i32) -> (i32, i32) {
    %c0_i32 = arith.constant 0 : i32
    %c0_i32_0 = arith.constant 0 : i32
    %c0_i32_1 = arith.constant 0 : i32
    return %c0_i32, %c0_i32_0 : i32, i32
  }
  func.func @transform_15(%arg0: i32) -> (i32, i32) {
    %c0_i32 = arith.constant 0 : i32
    %c0_i32_0 = arith.constant 0 : i32
    %c0_i32_1 = arith.constant 0 : i32
    return %c0_i32, %c0_i32_0 : i32, i32
  }
  func.func @transform_16(%arg0: i32) -> (i32, i32) {
    %c0_i32 = arith.constant 0 : i32
    %c0_i32_0 = arith.constant 0 : i32
    %c0_i32_1 = arith.constant 0 : i32
    return %c0_i32, %c0_i32_0 : i32, i32
  }
  func.func @transform_17(%arg0: i32) -> (i32, i32, i32) {
    %c0_i32 = arith.constant 0 : i32
    %c0_i32_0 = arith.constant 0 : i32
    %c0_i32_1 = arith.constant 0 : i32
    return %arg0, %c0_i32, %c0_i32_0 : i32, i32, i32
  }
}

</mosaic_0001>

<bundles_post_ra>
// kernel: tpu_custom_call.1
= control target key start
LH: loop header
LB: loop body
LE: loop exit
PB: predicated region body
PF: predicated region fallthrough
CT: control target
= control target key end

     0   :  { %s2745_s0 = inlined_call_operand.vmem [shape: f32[2,8,16,2], index: 0, kind: input, shape index: {}]   ;;  %s2746_s1 = inlined_call_operand.vmem [shape: f32[2,1,27], index: 1, kind: input, shape index: {}]   ;;  %s2747_s2 = inlined_call_operand.vmem [shape: f32[2,64], index: 2, kind: input, shape index: {}]   ;;  %s2748_s3 = inlined_call_operand.vmem [shape: f32[1,32], index: 3, kind: input, shape index: {}]   ;;  %s2749_s4 = inlined_call_operand.vmem [shape: f32[32,32], index: 4, kind: input, shape index: {}]   ;;  %s2750_s5 = inlined_call_operand.vmem [shape: f32[1,32], index: 5, kind: input, shape index: {}]   ;;  %s2751_s6 = inlined_call_operand.vmem [shape: f32[32,128], index: 6, kind: input, shape index: {}]   ;;  %s2752_s7 = inlined_call_operand.vmem [shape: f32[1,64], index: 7, kind: input, shape index: {}]   ;;  %s2753_s8 = inlined_call_operand.vmem [shape: f32[64,128], index: 8, kind: input, shape index: {}]   ;;  %s2754_s9 = inlined_call_operand.vmem [shape: f32[1,128], index: 9, kind: input, shape index: {}]   ;;  %s2755_s10 = inlined_call_operand.vmem [shape: f32[128,64], index: 10, kind: input, shape index: {}]   ;;  %s2756_s11 = inlined_call_operand.vmem [shape: f32[27,64], index: 11, kind: input, shape index: {}]   ;;  %s2757_s12 = inlined_call_operand.vmem [shape: f32[1,64], index: 12, kind: input, shape index: {}]   ;;  %s2758_s13 = inlined_call_operand.vmem [shape: f32[64,32], index: 13, kind: input, shape index: {}]   ;;  %s2759_s14 = inlined_call_operand.vmem [shape: f32[1,32], index: 14, kind: input, shape index: {}]   ;;  %s2760_s15 = inlined_call_operand.vmem [shape: f32[32,128], index: 15, kind: input, shape index: {}]   ;;  %s2761_s16 = inlined_call_operand.vmem [shape: f32[1,128], index: 16, kind: input, shape index: {}]   ;;  %s2762_s17 = inlined_call_operand.hbm [shape: f32[2,1,128], index: 17, kind: output, shape index: {}]  }
   0x1   :  { %2766 = sst [smem:[#allocation8_spill]] %s2745_s0 }
   0x2   :  { %2767 = sst [smem:[#allocation9_spill]] %s2746_s1 }
   0x3   :  { %2768 = sst [smem:[#allocation10_spill]] %s2747_s2 }
   0x4   :  { %2769 = sst [smem:[#allocation11_spill]] %s2748_s3 }
   0x5   :  { %22 = vsyncpa [#allocation3], 0 }
   0x6   :  { %24 = vsyncpa [#allocation3 + $0x1], 0  ;;  %s2226_s24 = smov 0   ;;  %s2228_s25 = smov 0  }
   0x7   :  { %s2230_s26 = smov 0   ;;  %s2232_s27 = smov 0  }
   0x8 LB: > { %2770 = sst [smem:[#allocation5_spill]] %s2121_s26  ;;  %s2247_s28 = sadd.s32 4294967295, %s2125_s27   ;;  %s2125_s27 = sphi %s2232_s27, %s2779_s27   ;;  %s2121_s26 = sphi %s2230_s26, %s2781_s26   ;;  %s2117_s25 = sphi %s2228_s25, %s2783_s25   ;;  %s2113_s24 = sphi %s2226_s24, %s2782_s24  }
   0x9   : > { %s1735_s29 = sadd.s32 4294967294, %s2125_s27   ;;  %s2251_s0 = sadd.s32 1, %s2125_s27  }
   0xa   : > { %2771 = sst [smem:[#allocation6_spill]] %s2251_s0  ;;  %s404_s30 = sadd.s32 1, %s2121_s26 }
   0xb   : > { %s401_s18 = ssub.s32 %s2125_s27, %s2251_s0  ;;  %p414_p0 = scmp.ne.s32.totalorder %s2121_s26, %s2117_s25 }
   0xc   : > { %p402_p1 = scmp.eq.s32.totalorder %s401_s18, 0  ;;  %p415_p2 = scmp.eq.s32.totalorder %s2247_s28, 1 }
   0xd   : > { %p420_p3 = scmp.ne.s32.totalorder %s2117_s25, %s2113_s24  ;;  %p421_p4 = scmp.eq.s32.totalorder %s1735_s29, 1 }
   0xe   : > { %s2262_s19 = scalar_select %p402_p1, %s2121_s26, %s404_s30  }
   0xf   : > { %p2264_p5 = por %p415_p2, %p414_p0  ;;  %p2268_p6 = por %p421_p4, %p420_p3 }
  0x10   : > { %2772 = sst [smem:[#allocation7_spill]] %s2262_s19  ;;  %p1738_p7 = scmp.ge.s32.totalorder %s2125_s27, 1 }
  0x11   : > { %p498_p8 = scmp.lt.s32.totalorder %s2125_s27, 3 }
  0x13   : > { %p499_p9 = pnand %p1738_p7, %p498_p8 }
  0x14   : > { %p552_p10 = scmp.lt.s32.totalorder (!%p499_p9), %s2247_s28, 1  ;;  %v2127_v0 = vmov (!%p499_p9), 0   ;;  %s2775_s30 = sld [smem:[#allocation8_spill]] (!%p499_p9)  ;;  %v2128_v6 = vmov (!%p499_p9), 1   ;;  %v657_v24 = vlaneseq (!%p499_p9)  ;;  %vm777_vm0 = vcmask (!%p499_p9), 523520  }
  0x15   : > { %502 = sbr.rel (%p499_p9) target bundleno = 1859 (0x743), region = 88  ;;  %2048 = vset.pattern.permute.xlu1 (!%p499_p9), %v2127_v0  ;;  %2047 = vset.pattern.permute.xlu0 (!%p499_p9), %v2127_v0  ;;  %s2776_s2 = sld [smem:[#allocation10_spill]] (!%p499_p9)  ;;  %vm2131_vm1 = vmmov (!%p499_p9), 0   ;;  %vm946_vm2 = vcmask (!%p499_p9), 261120   ;;  %vm1046_vm3 = vcmask (!%p499_p9), 1041409   ;;  %vm1048_vm4 = vcmask (!%p499_p9), 1042434  }
  0x16   : > { %v658_v27 = vshrl.u32 (!%p499_p9), %v657_v24, 7  ;;  %s2129_s29 = smov (!%p499_p9), 96   ;;  %s2777_s3 = sld [smem:[#allocation11_spill]] (!%p499_p9)  ;;  %vm1050_vm5 = vcmask (!%p499_p9), 1043459   ;;  %vm1052_vm6 = vcmask (!%p499_p9), 1044484   ;;  %vm1054_vm7 = vcmask (!%p499_p9), 1045509  }
  0x17   : > { %vm1056_vm8 = vcmask (!%p499_p9), 1046534   ;;  %vm1058_vm9 = vcmask (!%p499_p9), 1047559   ;;  %vm1209_vm10 = vcmask (!%p499_p9), 1048064   ;;  %vm1349_vm11 = vcmask (!%p499_p9), 1042432   ;;  %s2778_s19 = sld [smem:[#allocation9_spill]] (!%p499_p9)  ;;  %s550_s0 = sand.u32 (!%p499_p9), 1, %s2117_s25  }
  0x18   : > { %v743_v29 = vsub.s32 (!%p499_p9), 1, %v658_v27  ;;  %v659_v31 = vsub.s32 (!%p499_p9), 0, %v658_v27  ;;  %vm2134_vm12 = vmmov (!%p499_p9), 1   ;;  %vm1345_vm14 = vcmask (!%p499_p9), 220160  }
  0x19   : > { %vm1956_vm13 = vmpackc.low (!%p499_p9), %vm1349_vm11, %vm2134_vm12  ;;  %vm1233_vm15 = vcmask (!%p499_p9), 523264  }
  0x1b   : > { %v576_v33 = vld [vmem:[%s2776_s2] sm:$0x3] (!%p499_p9) }
  0x1c   : > { %s2278_s21 = scalar_select %p552_p10, %s2247_s28, 1  ;;  %v2315_v34 = vrot.slane %v576_v33, %v743_v29  ;;  %v2317_v36 = vrot.slane %v576_v33, %v659_v31 }
  0x1e   : > { %s1754_s22 = sshll.u32 %s2278_s21, 7 }
  0x1f   : > { %s2284_s18 = scalar_lea.vmem %s2775_s30, %s1754_s22  ;;  %s1751_s30 = sshll.u32 %s2247_s28, 4 }
  0x20   : > { %v562_v1 = vld [vmem:[%s2284_s18 + $0x10] sm:$0xff]  ;;  %v560_v2 = vld [vmem:[%s2284_s18] sm:$0xff]  ;;  %v563_v3 = vld [vmem:[%s2284_s18 + $0x18] sm:$0xff]  ;;  %s2703_s26 = scalar_lea.hbm %s2762_s17, %s1751_s30  ;;  %s2135_s28 = smov [#allocation2]  }
  0x21   : > { %589 = vperm.xlu1 %2048, %v562_v1   ;;  %579 = vperm.xlu0 %2047, %v560_v2   ;;  %v561_v4 = vld [vmem:[%s2284_s18 + $0x8] sm:$0xff]  ;;  %v566_v7 = vld [vmem:[%s2284_s18 + $0x30] sm:$0xff]  ;;  %v564_v9 = vld [vmem:[%s2284_s18 + $0x20] sm:$0xff] }
  0x22   : > { %v565_v5 = vld [vmem:[%s2284_s18 + $0x28] sm:$0xff]  ;;  %v570_v10 = vld [vmem:[%s2284_s18 + $0x50] sm:$0xff]  ;;  %v567_v13 = vld [vmem:[%s2284_s18 + $0x38] sm:$0xff] }
  0x23   : > { %v569_v8 = vld [vmem:[%s2284_s18 + $0x48] sm:$0xff]  ;;  %v574_v12 = vld [vmem:[%s2284_s18 + $0x70] sm:$0xff]  ;;  %v568_v14 = vld [vmem:[%s2284_s18 + $0x40] sm:$0xff] }
  0x24   : > { %v573_v11 = vld [vmem:[%s2284_s18 + $0x68] sm:$0xff]  ;;  %v571_v15 = vld [vmem:[%s2284_s18 + $0x58] sm:$0xff]  ;;  %v572_v16 = vld [vmem:[%s2284_s18 + $0x60] sm:$0xff] }
  0x25   : > { %594 = vperm.xlu1 %2048, %v563_v3   ;;  %584 = vperm.xlu0 %2047, %v561_v4   ;;  %v575_v17 = vld [vmem:[%s2284_s18 + $0x78] sm:$0xff]  ;;  %s2133_s18 = smov 64  }
  0x29   : > { %2049 = vset.pattern.permute.xlu1 %v2128_v6  ;;  %604 = vperm.xlu0 %2047, %v565_v5  }
  0x2a   : > { %682 = vperm.xlu1 %2049, %v561_v4  }
  0x2d   : > { %609 = vperm.xlu0 %2047, %v566_v7  }
  0x2e   : > { %686 = vperm.xlu1 %2049, %v562_v1  }
  0x31   : > { %624 = vperm.xlu0 %2047, %v569_v8  }
  0x32   : > { %2050 = vset.pattern.permute.xlu1 %v2127_v0 }
  0x33   : > { %599 = vperm.xlu1 %2050, %v564_v9  }
  0x35   : > { %629 = vperm.xlu0 %2047, %v570_v10  }
  0x37   : > { %2051 = vset.pattern.permute.xlu1 %v2128_v6 }
  0x38   : > { %694 = vperm.xlu1 %2051, %v564_v9  }
  0x39   : > { %644 = vperm.xlu0 %2047, %v573_v11  }
  0x3c   : > { %698 = vperm.xlu1 %2051, %v565_v5  }
  0x3d   : > { %649 = vperm.xlu0 %2047, %v574_v12  }
  0x40   : > { %2052 = vset.pattern.permute.xlu1 %v2127_v0 }
  0x41   : > { %614 = vperm.xlu1 %2052, %v567_v13   ;;  %2060 = vset.pattern.permute.xlu0 %v2128_v6 }
  0x42   : > { %678 = vperm.xlu0 %2060, %v560_v2  }
  0x45   : > { %2053 = vset.pattern.permute.xlu1 %v2128_v6 }
  0x46   : > { %706 = vperm.xlu1 %2053, %v567_v13   ;;  %690 = vperm.xlu0 %2060, %v563_v3  }
  0x4a   : > { %2054 = vset.pattern.permute.xlu1 %v2127_v0  ;;  %702 = vperm.xlu0 %2060, %v566_v7  }
  0x4b   : > { %619 = vperm.xlu1 %2054, %v568_v14  }
  0x4e   : > { %718 = vperm.xlu0 %2060, %v570_v10  }
  0x4f   : > { %2055 = vset.pattern.permute.xlu1 %v2128_v6 }
  0x50   : > { %710 = vperm.xlu1 %2055, %v568_v14  }
  0x52   : > { %734 = vperm.xlu0 %2060, %v574_v12  }
  0x54   : > { %714 = vperm.xlu1 %2055, %v569_v8  }
  0x58   : > { %2056 = vset.pattern.permute.xlu1 %v2127_v0 }
  0x59   : > { %634 = vperm.xlu1 %2056, %v571_v15  }
  0x5d   : > { %2057 = vset.pattern.permute.xlu1 %v2128_v6 }
  0x5e   : > { %722 = vperm.xlu1 %2057, %v571_v15  }
  0x62   : > { %2058 = vset.pattern.permute.xlu1 %v2127_v0 }
  0x63   : > { %639 = vperm.xlu1 %2058, %v572_v16  }
  0x67   : > { %2059 = vset.pattern.permute.xlu1 %v2128_v6 }
  0x68   : > { %726 = vperm.xlu1 %2059, %v572_v16  }
  0x6c   : > { %730 = vperm.xlu1 %2059, %v573_v11  }
  0x70   : > { %2061 = vset.pattern.permute.xlu1 %v2127_v0 }
  0x71   : > { %654 = vperm.xlu1 %2061, %v575_v17  }
  0x75   : > { %2062 = vset.pattern.permute.xlu1 %v2128_v6 }
  0x76   : > { %738 = vperm.xlu1 %2062, %v575_v17  }
  0xa0   : > { %v590_v18 = vpop.permute.xlu1 %589  ;;  %v580_v19 = vpop.permute.xlu0 %579 }
  0xa1   : > { %v661_v48 = vmul.f32 %v2317_v36, %v580_v19  ;;  %v663_v58 = vmul.f32 %v2317_v36, %v590_v18 }
  0xa4   : > { %v595_v20 = vpop.permute.xlu1 %594  ;;  %v585_v21 = vpop.permute.xlu0 %584 }
  0xa5   : > { %v662_v45 = vmul.f32 %v2317_v36, %v585_v21  ;;  %v664_v60 = vmul.f32 %v2317_v36, %v595_v20 }
  0xa8   : > { %v605_v22 = vpop.permute.xlu0 %604 }
  0xa9   : > { %v683_v23 = vpop.permute.xlu1 %682  ;;  %v666_v39 = vmul.f32 %v2317_v36, %v605_v22 }
  0xaa   : > { %v746_v46 = vmul.f32 %v2315_v34, %v683_v23 }
  0xac   : > { %v610_v25 = vpop.permute.xlu0 %609  ;;  %v2338_v52 = vadd.f32 %v746_v46, %v662_v45 }
  0xad   : > { %v687_v26 = vpop.permute.xlu1 %686  ;;  %v667_v8 = vmul.f32 %v2317_v36, %v610_v25 }
  0xae   : > { %v747_v55 = vmul.f32 %v2315_v34, %v687_v26  ;;  %v779_v61 = vsel %vm777_vm0, %v2338_v52, 0.0 }
  0xb0   : > { %v2308_v28 = vpop.permute.xlu0 %624  ;;  %v2348_v1 = vadd.f32 %v747_v55, %v663_v58 }
  0xb1   : > { %v670_v46 = vmul.f32 %v2317_v36, %v2308_v28 }
  0xb2   : > { %v600_v30 = vpop.permute.xlu1 %599  ;;  %v787_v12 = vsel %vm777_vm0, %v2348_v1, 0.0 }
  0xb3   : > { %v665_v40 = vmul.f32 %v2317_v36, %v600_v30 }
  0xb4   : > { %v2310_v32 = vpop.permute.xlu0 %629 }
  0xb7   : > { %v695_v35 = vpop.permute.xlu1 %694 }
  0xb8   : > { %v749_v37 = vmul.f32 %v2315_v34, %v695_v35  ;;  %v2320_v38 = vpop.permute.xlu0 %644 }
  0xba   : > { %v2324_v42 = vadd.f32 %v749_v37, %v665_v40 }
  0xbb   : > { %v699_v41 = vpop.permute.xlu1 %698 }
  0xbc   : > { %v750_v43 = vmul.f32 %v2315_v34, %v699_v41  ;;  %v2327_v44 = vpop.permute.xlu0 %649  ;;  %v796_v49 = vsel %vm777_vm0, %v2324_v42, 0.0 }
  0xbe   : > { %v2331_v47 = vadd.f32 %v750_v43, %v666_v39 }
  0xc0   : > { %v797_v50 = vsel %vm777_vm0, %v2331_v47, 0.0  ;;  %v615_v51 = vpop.permute.xlu1 %614 }
  0xc1   : > { %v798_v53 = vadd.f32 %v797_v50, %v796_v49  ;;  %v679_v54 = vpop.permute.xlu0 %678  ;;  %v668_v6 = vmul.f32 %v2317_v36, %v615_v51 }
  0xc2   : > { %v745_v56 = vmul.f32 %v2315_v34, %v679_v54 }
  0xc3   : > { %v799_v57 = vrot.slane %v798_v53, 4 }
  0xc4   : > { %v2343_v59 = vadd.f32 %v745_v56, %v661_v48 }
  0xc5   : > { %v800_v62 = vadd.f32 %v799_v57, %v798_v53  ;;  %v707_v63 = vpop.permute.xlu1 %706  ;;  %v691_v0 = vpop.permute.xlu0 %690 }
  0xc6   : > { %v778_v2 = vsel %vm777_vm0, %v2343_v59, 0.0  ;;  %v752_v3 = vmul.f32 %v2315_v34, %v707_v63  ;;  %v748_v4 = vmul.f32 %v2315_v34, %v691_v0 }
  0xc7   : > { %v780_v5 = vadd.f32 %v779_v61, %v778_v2  ;;  %v801_v11 = vrot.slane %v800_v62, 2 }
  0xc8   : > { %v2355_v7 = vadd.f32 %v748_v4, %v664_v60  ;;  %v2360_v13 = vadd.f32 %v752_v3, %v668_v6  ;;  %v671_v6 = vmul.f32 %v2317_v36, %v2310_v32 }
  0xc9   : > { %v781_v9 = vrot.slane %v780_v5, 4  ;;  %v703_v10 = vpop.permute.xlu0 %702  ;;  %v802_v22 = vadd.f32 %v801_v11, %v800_v62 }
  0xca   : > { %v788_v14 = vsel %vm777_vm0, %v2355_v7, 0.0  ;;  %v751_v15 = vmul.f32 %v2315_v34, %v703_v10  ;;  %v620_v16 = vpop.permute.xlu1 %619  ;;  %v806_v23 = vsel %vm777_vm0, %v2360_v13, 0.0 }
  0xcb   : > { %v782_v17 = vadd.f32 %v781_v9, %v780_v5  ;;  %v789_v18 = vadd.f32 %v788_v14, %v787_v12  ;;  %v803_v35 = vrot.slane %v802_v22, 1  ;;  %v669_v39 = vmul.f32 %v2317_v36, %v620_v16 }
  0xcc   : > { %v2365_v19 = vadd.f32 %v751_v15, %v667_v8 }
  0xcd   : > { %v790_v20 = vrot.slane %v789_v18, 4  ;;  %v783_v21 = vrot.slane %v782_v17, 2  ;;  %v804_v51 = vadd.f32 %v803_v35, %v802_v22  ;;  %v719_v56 = vpop.permute.xlu0 %718 }
  0xce   : > { %v805_v24 = vsel %vm777_vm0, %v2365_v19, 0.0  ;;  %v755_v3 = vmul.f32 %v2315_v34, %v719_v56 }
  0xcf   : > { %v791_v25 = vadd.f32 %v790_v20, %v789_v18  ;;  %v807_v26 = vadd.f32 %v806_v23, %v805_v24  ;;  %v711_v27 = vpop.permute.xlu1 %710  ;;  %v784_v29 = vadd.f32 %v783_v21, %v782_v17  ;;  %v853_v63 = vmul.f32 0.0625, %v804_v51 }
  0xd0   : > { %v753_v30 = vmul.f32 %v2315_v34, %v711_v27  ;;  %v2390_v11 = vadd.f32 %v755_v3, %v671_v6 }
  0xd1   : > { %v808_v31 = vrot.slane %v807_v26, 4  ;;  %v785_v33 = vrot.slane %v784_v29, 1  ;;  %v792_v37 = vrot.slane %v791_v25, 2 }
  0xd2   : > { %v2375_v48 = vadd.f32 %v753_v30, %v669_v39  ;;  %v823_v18 = vsel %vm777_vm0, %v2390_v11, 0.0 }
  0xd3   : > { %v809_v40 = vadd.f32 %v808_v31, %v807_v26  ;;  %v715_v41 = vpop.permute.xlu1 %714  ;;  %v786_v43 = vadd.f32 %v785_v33, %v784_v29  ;;  %v793_v45 = vadd.f32 %v792_v37, %v791_v25  ;;  %v674_v37 = vmul.f32 %v2317_v36, %v2320_v38 }
  0xd4   : > { %v754_v49 = vmul.f32 %v2315_v34, %v715_v41  ;;  %v814_v60 = vsel %vm777_vm0, %v2375_v48, 0.0 }
  0xd5   : > { %v851_v50 = vmul.f32 0.0625, %v786_v43  ;;  %v794_v53 = vrot.slane %v793_v45, 1  ;;  %v810_v54 = vrot.slane %v809_v40, 2 }
  0xd6   : > { %v2378_v55 = vadd.f32 %v754_v49, %v670_v46 }
  0xd7   : > { %867 = vrot.lane.b32.xlu1 %v851_v50, %s2129_s29  ;;  %v795_v57 = vadd.f32 %v794_v53, %v793_v45  ;;  %v811_v58 = vadd.f32 %v810_v54, %v809_v40  ;;  %v735_v45 = vpop.permute.xlu0 %734 }
  0xd8   : > { %v815_v28 = vsel %vm777_vm0, %v2378_v55, 0.0  ;;  %v635_v61 = vpop.permute.xlu1 %634  ;;  %v759_v38 = vmul.f32 %v2315_v34, %v735_v45 }
  0xd9   : > { %v816_v62 = vadd.f32 %v815_v28, %v814_v60  ;;  %v852_v0 = vmul.f32 0.0625, %v795_v57  ;;  %v812_v2 = vrot.slane %v811_v58, 1  ;;  %v672_v12 = vmul.f32 %v2317_v36, %v635_v61 }
  0xda   : > { %v675_v57 = vmul.f32 %v2317_v36, %v2327_v44 }
  0xdb   : > { %v817_v4 = vrot.slane %v816_v62, 4  ;;  %871 = vrot.lane.b32.xlu1 %v853_v63, %s2129_s29  ;;  %869 = vrot.lane.b32.xlu0 %v852_v0, %s2129_s29  ;;  %v813_v5 = vadd.f32 %v812_v2, %v811_v58 }
  0xdc   : > { %v2419_v28 = vadd.f32 %v759_v38, %v675_v57 }
  0xdd   : > { %v818_v8 = vadd.f32 %v817_v4, %v816_v62  ;;  %v723_v9 = vpop.permute.xlu1 %722  ;;  %v854_v10 = vmul.f32 0.0625, %v813_v5 }
  0xde   : > { %v756_v14 = vmul.f32 %v2315_v34, %v723_v9  ;;  %v841_v3 = vsel %vm777_vm0, %v2419_v28, 0.0 }
  0xdf   : > { %873 = vrot.lane.b32.xlu0 %v854_v10, %s2129_s29  ;;  %v819_v15 = vrot.slane %v818_v8, 2 }
  0xe0   : > { %v2395_v16 = vadd.f32 %v756_v14, %v672_v12 }
  0xe1   : > { %v820_v17 = vadd.f32 %v819_v15, %v818_v8 }
  0xe2   : > { %v824_v32 = vsel %vm777_vm0, %v2395_v16, 0.0  ;;  %v640_v20 = vpop.permute.xlu1 %639 }
  0xe3   : > { %v825_v21 = vadd.f32 %v824_v32, %v823_v18  ;;  %v821_v22 = vrot.slane %v820_v17, 1  ;;  %v673_v31 = vmul.f32 %v2317_v36, %v640_v20  ;;  %v1028_v18 = vld [vmem:[%s2749_s4 + $0x8] sm:$0xff]  ;;  %v1029_v32 = vld [vmem:[%s2749_s4 + $0x10] sm:$0xff]  ;;  %v2130_v20 = vmov 0.0|0.0  }
  0xe4   : > { %1927 = vmatprep.subr.bf16.mxu0 %v2130_v20  ;;  %1933 = vmatprep.subr.bf16.mxu1 %v2130_v20 }
  0xe5   : > { %v826_v23 = vrot.slane %v825_v21, 4  ;;  %v822_v24 = vadd.f32 %v821_v22, %v820_v17  ;;  %v1027_v17 = vld [vmem:[%s2749_s4] sm:$0xff]  ;;  %v1030_v22 = vld [vmem:[%s2749_s4 + $0x18] sm:$0xff] }
  0xe7   : > { %v827_v25 = vadd.f32 %v826_v23, %v825_v21  ;;  %v727_v26 = vpop.permute.xlu1 %726  ;;  %v855_v27 = vmul.f32 0.0625, %v822_v24  ;;  %v1928_v21 = vpack.c.bf16 %v1028_v18, %v1027_v17  ;;  %v2132_v23 = vmov 0.0  }
  0xe8   : > { %v757_v29 = vmul.f32 %v2315_v34, %v727_v26  ;;  %1818 = vmatprep.mubr.msk.f32.mxu0 %vm2131_vm1, %v2132_v23  ;;  %1829 = vmatprep.mubr.msk.f32.mxu1 %vm2131_vm1, %v2132_v23  ;;  %v1931_v24 = vpack.c.bf16 %v1030_v22, %v1029_v32  ;;  %v1133_v26 = vld [vmem:[%s2751_s6 + $0x8] sm:$0xff] }
  0xe9   : > { %875 = vrot.lane.b32.xlu1 %v855_v27, %s2129_s29  ;;  %v828_v30 = vrot.slane %v827_v25, 2  ;;  %1929 = vmatpush3.bf16.msra.mxu0 %v1928_v21 }
  0xea   : > { %v2406_v39 = vadd.f32 %v757_v29, %v673_v31  ;;  %1930 = vmatprep.subr.bf16.mxu0 %v2130_v20 }
  0xeb   : > { %v731_v33 = vpop.permute.xlu1 %730  ;;  %v829_v35 = vadd.f32 %v828_v30, %v827_v25  ;;  %v1132_v25 = vld [vmem:[%s2751_s6] sm:$0xff] }
  0xec   : > { %v758_v40 = vmul.f32 %v2315_v34, %v731_v33  ;;  %v832_v49 = vsel %vm777_vm0, %v2406_v39, 0.0  ;;  %v1934_v27 = vpack.c.bf16 %v1133_v26, %v1132_v25 }
  0xed   : > { %v830_v41 = vrot.slane %v829_v35, 1  ;;  %1932 = vmatpush3.bf16.msra.mxu0 %v1931_v24 }
  0xee   : > { %v2409_v43 = vadd.f32 %v758_v40, %v674_v37  ;;  %1939 = vmatprep.subr.bf16.mxu0 %v2130_v20  ;;  %1935 = vmatpush3.bf16.msra.mxu1 %v1934_v27  ;;  %v2463_v40 = vld [vmem:[%s2777_s3] ss:$0 sm:$0xff] }
  0xef   : > { %v831_v46 = vadd.f32 %v830_v41, %v829_v35  ;;  %1936 = vmatprep.subr.bf16.mxu1 %v2130_v20 }
  0xf0   : > { %v833_v50 = vsel %vm777_vm0, %v2409_v43, 0.0  ;;  %v655_v51 = vpop.permute.xlu1 %654 }
  0xf1   : > { %v834_v53 = vadd.f32 %v833_v50, %v832_v49  ;;  %v856_v54 = vmul.f32 0.0625, %v831_v46  ;;  %v676_v61 = vmul.f32 %v2317_v36, %v655_v51 }
  0xf3   : > { %v835_v56 = vrot.slane %v834_v53, 4  ;;  %877 = vrot.lane.b32.xlu0 %v856_v54, %s2129_s29 }
  0xf5   : > { %v836_v58 = vadd.f32 %v835_v56, %v834_v53  ;;  %v739_v60 = vpop.permute.xlu1 %738 }
  0xf6   : > { %v760_v62 = vmul.f32 %v2315_v34, %v739_v60 }
  0xf7   : > { %v837_v63 = vrot.slane %v836_v58, 2 }
  0xf8   : > { %v2423_v0 = vadd.f32 %v760_v62, %v676_v61 }
  0xf9   : > { %v838_v2 = vadd.f32 %v837_v63, %v836_v58 }
  0xfa   : > { %v842_v4 = vsel %vm777_vm0, %v2423_v0, 0.0 }
  0xfb   : > { %v843_v5 = vadd.f32 %v842_v4, %v841_v3  ;;  %v839_v44 = vrot.slane %v838_v2, 1 }
  0xfd   : > { %v844_v6 = vrot.slane %v843_v5, 4  ;;  %v840_v8 = vadd.f32 %v839_v44, %v838_v2 }
  0xff   : > { %v845_v9 = vadd.f32 %v844_v6, %v843_v5  ;;  %v857_v10 = vmul.f32 0.0625, %v840_v8 }
 0x101   : > { %879 = vrot.lane.b32.xlu1 %v857_v10, %s2129_s29  ;;  %v846_v36 = vrot.slane %v845_v9, 2 }
 0x103   : > { %v847_v34 = vadd.f32 %v846_v36, %v845_v9 }
 0x105   : > { %v848_v12 = vrot.slane %v847_v34, 1 }
 0x107   : > { %v849_v14 = vadd.f32 %v848_v12, %v847_v34 }
 0x109   : > { %v858_v15 = vmul.f32 0.0625, %v849_v14 }
 0x10b   : > { %881 = vrot.lane.b32.xlu0 %v858_v15, %s2129_s29  ;;  %s559_s29 = scalar_lea.vmem %s2778_s19, %s2278_s21  ;;  %s1659_s21 = scalar_lea.sflag [#allocation3], %s550_s0 }
 0x10c   : > { %s2067_s19 = sshll.u32 %s2135_s28, 4  ;;  %s2068_s19 = int_to_ptr.vmem [resolvable:$false] %s2067_s19 }
 0x149   : > { %v868_v29 = vpop.permute.xlu1 %867 }
 0x14a   : > { %v891_v41 = vadd.f32 %v868_v29, %v2343_v59  ;;  %v892_v45 = vadd.f32 %v868_v29, %v2338_v52 }
 0x14c   : > { %v914_v59 = vadd.f32 %v2463_v40, %v891_v41  ;;  %v915_v52 = vadd.f32 %v2463_v40, %v892_v45 }
 0x14d   : > { %v870_v30 = vpop.permute.xlu0 %869  ;;  %v872_v31 = vpop.permute.xlu1 %871 }
 0x14e   : > { %v893_v33 = vadd.f32 %v870_v30, %v2348_v1  ;;  %v894_v35 = vadd.f32 %v870_v30, %v2355_v7  ;;  %v895_v49 = vadd.f32 %v872_v31, %v2324_v42  ;;  %v896_v50 = vadd.f32 %v872_v31, %v2331_v47 }
 0x14f   : > { %v930_v62 = vmax.f32 %v914_v59, 0.0  ;;  %v931_v63 = vmax.f32 %v915_v52, 0.0 }
 0x150   : > { %v916_v51 = vadd.f32 %v2463_v40, %v893_v33  ;;  %v917_v1 = vadd.f32 %v2463_v40, %v894_v35  ;;  %v918_v42 = vadd.f32 %v2463_v40, %v895_v49  ;;  %v919_v47 = vadd.f32 %v2463_v40, %v896_v50 }
 0x151   : > { %v874_v37 = vpop.permute.xlu0 %873  ;;  %v947_v10 = vsel %vm946_vm2, %v930_v62, 0.0  ;;  %v948_v36 = vsel %vm946_vm2, %v931_v63, 0.0 }
 0x152   : > { %v897_v7 = vadd.f32 %v874_v37, %v2365_v19  ;;  %v898_v53 = vadd.f32 %v874_v37, %v2360_v13  ;;  %v932_v56 = vmax.f32 %v916_v51, 0.0  ;;  %v933_v57 = vmax.f32 %v917_v1, 0.0 }
 0x153   : > { %v934_v4 = vmax.f32 %v918_v42, 0.0  ;;  %v935_v5 = vmax.f32 %v919_v47, 0.0  ;;  %v949_v21 = vadd.f32 %v948_v36, %v947_v10 }
 0x154   : > { %v920_v60 = vadd.f32 %v2463_v40, %v897_v7  ;;  %v921_v19 = vadd.f32 %v2463_v40, %v898_v53  ;;  %v956_v44 = vsel %vm946_vm2, %v932_v56, 0.0  ;;  %v957_v6 = vsel %vm946_vm2, %v933_v57, 0.0 }
 0x155   : > { %v965_v14 = vsel %vm946_vm2, %v934_v4, 0.0  ;;  %v966_v15 = vsel %vm946_vm2, %v935_v5, 0.0  ;;  %v958_v17 = vadd.f32 %v957_v6, %v956_v44  ;;  %v950_v33 = vrot.slane %v949_v21, 4 }
 0x156   : > { %v937_v8 = vmax.f32 %v921_v19, 0.0  ;;  %v967_v25 = vadd.f32 %v966_v15, %v965_v14 }
 0x157   : > { %v959_v29 = vrot.slane %v958_v17, 4  ;;  %v951_v53 = vadd.f32 %v950_v33, %v949_v21 }
 0x158   : > { %v975_v32 = vsel %vm946_vm2, %v937_v8, 0.0  ;;  %v968_v41 = vrot.slane %v967_v25, 4 }
 0x159   : > { %v960_v49 = vadd.f32 %v959_v29, %v958_v17 }
 0x15b   : > { %v876_v46 = vpop.permute.xlu1 %875  ;;  %v961_v42 = vrot.slane %v960_v49, 2 }
 0x15c   : > { %v899_v54 = vadd.f32 %v876_v46, %v2375_v48  ;;  %v900_v38 = vadd.f32 %v876_v46, %v2378_v55 }
 0x15e   : > { %v922_v55 = vadd.f32 %v2463_v40, %v899_v54  ;;  %v923_v61 = vadd.f32 %v2463_v40, %v900_v38  ;;  %v969_v38 = vadd.f32 %v968_v41, %v967_v25 }
 0x160   : > { %v939_v9 = vmax.f32 %v923_v61, 0.0  ;;  %v970_v19 = vrot.slane %v969_v38, 2 }
 0x162   : > { %v984_v24 = vsel %vm946_vm2, %v939_v9, 0.0  ;;  %v971_v44 = vadd.f32 %v970_v19, %v969_v38  ;;  %v1742_v19 = vld [vmem:[%s2750_s5] ss:$0 sm:$0xff] }
 0x164   : > { %v972_v15 = vrot.slane %v971_v44, 1 }
 0x165   : > { %v878_v58 = vpop.permute.xlu0 %877 }
 0x166   : > { %v901_v13 = vadd.f32 %v878_v58, %v2390_v11  ;;  %v902_v48 = vadd.f32 %v878_v58, %v2395_v16  ;;  %v936_v11 = vmax.f32 %v920_v60, 0.0  ;;  %v938_v16 = vmax.f32 %v922_v55, 0.0 }
 0x168   : > { %v924_v2 = vadd.f32 %v2463_v40, %v901_v13  ;;  %v925_v3 = vadd.f32 %v2463_v40, %v902_v48  ;;  %v974_v18 = vsel %vm946_vm2, %v936_v11, 0.0  ;;  %v983_v22 = vsel %vm946_vm2, %v938_v16, 0.0 }
 0x169   : > { %v976_v30 = vadd.f32 %v975_v32, %v974_v18  ;;  %v985_v31 = vadd.f32 %v984_v24, %v983_v22  ;;  %v962_v13 = vadd.f32 %v961_v42, %v960_v49 }
 0x16a   : > { %v940_v34 = vmax.f32 %v924_v2, 0.0  ;;  %v941_v12 = vmax.f32 %v925_v3, 0.0 }
 0x16b   : > { %v977_v50 = vrot.slane %v976_v30, 4  ;;  %v986_v51 = vrot.slane %v985_v31, 4  ;;  %v963_v8 = vrot.slane %v962_v13, 1 }
 0x16c   : > { %v992_v26 = vsel %vm946_vm2, %v940_v34, 0.0  ;;  %v993_v27 = vsel %vm946_vm2, %v941_v12, 0.0 }
 0x16d   : > { %v994_v35 = vadd.f32 %v993_v27, %v992_v26  ;;  %v978_v47 = vadd.f32 %v977_v50, %v976_v30  ;;  %v987_v56 = vadd.f32 %v986_v51, %v985_v31  ;;  %v964_v18 = vadd.f32 %v963_v8, %v962_v13 }
 0x16e   : > { %v973_v26 = vadd.f32 %v972_v15, %v971_v44  ;;  %v1243_v44 = vld [vmem:[%s2753_s8 + $0x8] sm:$0xff] }
 0x16f   : > { %v995_v54 = vrot.slane %v994_v35, 4  ;;  %v979_v48 = vrot.slane %v978_v47, 2  ;;  %v988_v62 = vrot.slane %v987_v56, 2  ;;  %v1020_v29 = vmul.f32 0.0625, %v964_v18  ;;  %v1341_v18 = vld [vmem:[%s2756_s11] sm:$0xff] }
 0x171   : > { %v996_v58 = vadd.f32 %v995_v54, %v994_v35  ;;  %v980_v16 = vadd.f32 %v979_v48, %v978_v47  ;;  %v989_v10 = vadd.f32 %v988_v62, %v987_v56 }
 0x173   : > { %v880_v37 = vpop.permute.xlu1 %879  ;;  %v997_v4 = vrot.slane %v996_v58, 2  ;;  %v981_v32 = vrot.slane %v980_v16, 1  ;;  %v990_v22 = vrot.slane %v989_v10, 1 }
 0x174   : > { %v903_v45 = vadd.f32 %v880_v37, %v2406_v39  ;;  %v904_v46 = vadd.f32 %v880_v37, %v2409_v43  ;;  %v952_v43 = vrot.slane %v951_v53, 2 }
 0x175   : > { %v998_v14 = vadd.f32 %v997_v4, %v996_v58  ;;  %v982_v30 = vadd.f32 %v981_v32, %v980_v16  ;;  %v991_v33 = vadd.f32 %v990_v22, %v989_v10  ;;  %v1135_v58 = vld [vmem:[%s2751_s6 + $0x18] sm:$0xff]  ;;  %v1244_v16 = vld [vmem:[%s2753_s8 + $0x10] sm:$0xff]  ;;  %v1342_v32 = vld [vmem:[%s2756_s11 + $0x8] sm:$0xff] }
 0x176   : > { %v926_v1 = vadd.f32 %v2463_v40, %v903_v45  ;;  %v927_v7 = vadd.f32 %v2463_v40, %v904_v46  ;;  %v953_v3 = vadd.f32 %v952_v43, %v951_v53  ;;  %v1021_v45 = vmul.f32 0.0625, %v973_v26  ;;  %v1134_v43 = vld [vmem:[%s2751_s6 + $0x10] sm:$0xff]  ;;  %v1326_v26 = vld [vmem:[%s2755_s10 + $0x8] sm:$0xff] }
 0x177   : > { %v1022_v49 = vmul.f32 0.0625, %v982_v30  ;;  %v1952_v22 = vpack.c.bf16 %v1342_v32, %v1341_v18  ;;  %v1327_v30 = vld [vmem:[%s2755_s10 + $0x10] sm:$0xff]  ;;  %v1493_v32 = vld [vmem:[%s2757_s12] sm:$0x1] }
 0x178   : > { %v942_v59 = vmax.f32 %v926_v1, 0.0  ;;  %v943_v52 = vmax.f32 %v927_v7, 0.0  ;;  %v954_v12 = vrot.slane %v953_v3, 1  ;;  %v1023_v1 = vmul.f32 0.0625, %v991_v33 }
 0x17a   : > { %v1001_v57 = vsel %vm946_vm2, %v942_v59, 0.0  ;;  %v1002_v39 = vsel %vm946_vm2, %v943_v52, 0.0  ;;  %v955_v24 = vadd.f32 %v954_v12, %v953_v3  ;;  %v1246_v12 = vld [vmem:[%s2753_s8 + $0x20] sm:$0xff] }
 0x17b   : > { %v1003_v60 = vadd.f32 %v1002_v39, %v1001_v57 }
 0x17c   : > { %v1019_v35 = vmul.f32 0.0625, %v955_v24  ;;  %v1344_v24 = vld [vmem:[%s2756_s11 + $0x18] sm:$0x7] }
 0x17d   : > { %v1004_v55 = vrot.slane %v1003_v60, 4  ;;  %v882_v61 = vpop.permute.xlu0 %881 }
 0x17e   : > { %v905_v63 = vadd.f32 %v882_v61, %v2419_v28  ;;  %v906_v2 = vadd.f32 %v882_v61, %v2423_v0  ;;  %v1047_v51 = vsel %vm1046_vm3, %v1020_v29, %v1019_v35  ;;  %v1329_v35 = vld [vmem:[%s2755_s10 + $0x20] sm:$0xff] }
 0x17f   : > { %v1005_v5 = vadd.f32 %v1004_v55, %v1003_v60  ;;  %v1049_v38 = vsel %vm1048_vm4, %v1021_v45, %v1047_v51  ;;  %v1937_v60 = vpack.c.bf16 %v1135_v58, %v1134_v43  ;;  %v1331_v45 = vld [vmem:[%s2755_s10 + $0x30] sm:$0xff]  ;;  %v1334_v51 = vld [vmem:[%s2755_s10 + $0x48] sm:$0xff] }
 0x180   : > { %v928_v6 = vadd.f32 %v2463_v40, %v905_v63  ;;  %v929_v11 = vadd.f32 %v2463_v40, %v906_v2  ;;  %v999_v40 = vrot.slane %v998_v14, 1  ;;  %v1051_v52 = vsel %vm1050_vm5, %v1022_v49, %v1049_v38  ;;  %v1337_v38 = vld [vmem:[%s2755_s10 + $0x60] sm:$0xff] }
 0x181   : > { %v1006_v9 = vrot.slane %v1005_v5, 2  ;;  %v1053_v42 = vsel %vm1052_vm6, %v1023_v1, %v1051_v52  ;;  %1938 = vmatpush3.bf16.msra.mxu1 %v1937_v60 }
 0x182   : > { %v944_v36 = vmax.f32 %v928_v6, 0.0  ;;  %v945_v34 = vmax.f32 %v929_v11, 0.0  ;;  %v1000_v41 = vadd.f32 %v999_v40, %v998_v14  ;;  %1951 = vmatprep.subr.bf16.mxu1 %v2130_v20  ;;  %v1247_v14 = vld [vmem:[%s2753_s8 + $0x28] sm:$0xff] }
 0x183   : > { %v1007_v28 = vadd.f32 %v1006_v9, %v1005_v5  ;;  %v1242_v5 = vld [vmem:[%s2753_s8] sm:$0xff]  ;;  %v1245_v9 = vld [vmem:[%s2753_s8 + $0x18] sm:$0xff]  ;;  %v1946_v15 = vpack.c.bf16 %v1247_v14, %v1246_v12  ;;  %v1501_v14 = vld [vmem:[%s2758_s13 + $0x28] sm:$0xff] }
 0x184   : > { %v1010_v0 = vsel %vm946_vm2, %v944_v36, 0.0  ;;  %v1011_v17 = vsel %vm946_vm2, %v945_v34, 0.0  ;;  %v1024_v53 = vmul.f32 0.0625, %v1000_v41  ;;  %v1940_v11 = vpack.c.bf16 %v1243_v44, %v1242_v5  ;;  %v1498_v5 = vld [vmem:[%s2758_s13 + $0x10] sm:$0xff]  ;;  %v1500_v12 = vld [vmem:[%s2758_s13 + $0x20] sm:$0xff] }
 0x185   : > { %v1012_v21 = vadd.f32 %v1011_v17, %v1010_v0  ;;  %v1008_v27 = vrot.slane %v1007_v28, 1  ;;  %v1943_v36 = vpack.c.bf16 %v1245_v9, %v1244_v16  ;;  %v1249_v0 = vld [vmem:[%s2753_s8 + $0x38] sm:$0xff]  ;;  %v1250_v9 = vld [vmem:[%s2754_s9] sm:$0x1] }
 0x186   : > { %v1055_v56 = vsel %vm1054_vm7, %v1024_v53, %v1053_v42  ;;  %v1336_v53 = vld [vmem:[%s2755_s10 + $0x58] sm:$0xff]  ;;  %v1745_v42 = vld [vmem:[%s2752_s7] ss:$0 sm:$0xff] }
 0x187   : > { %v1013_v25 = vrot.slane %v1012_v21, 4  ;;  %v1009_v46 = vadd.f32 %v1008_v27, %v1007_v28  ;;  %v1248_v28 = vld [vmem:[%s2753_s8 + $0x30] sm:$0xff]  ;;  %v1324_v27 = vld [vmem:[%s559_s29] sm:$0x1]  ;;  %s2069_s29 = scalar_lea.vmem %s2068_s19, 32 }
 0x188   : > { %v1949_v17 = vpack.c.bf16 %v1249_v0, %v1248_v28  ;;  %v1502_v28 = vld [vmem:[%s2758_s13 + $0x30] sm:$0xff]  ;;  %v1503_v0 = vld [vmem:[%s2758_s13 + $0x38] sm:$0xff] }
 0x189   : > { %v1014_v31 = vadd.f32 %v1013_v25, %v1012_v21  ;;  %v1025_v54 = vmul.f32 0.0625, %v1009_v46  ;;  %v1343_v21 = vld [vmem:[%s2756_s11 + $0x10] sm:$0xff]  ;;  %v1325_v25 = vld [vmem:[%s2755_s10] sm:$0xff]  ;;  %v1332_v46 = vld [vmem:[%s2755_s10 + $0x38] sm:$0xff] }
 0x18a   : > { %v1955_v40 = vpack.c.bf16 %v1344_v24, %v1343_v21  ;;  %v1959_v29 = vpack.c.bf16 %v1326_v26, %v1325_v25  ;;  %v1968_v49 = vpack.c.bf16 %v1332_v46, %v1331_v45  ;;  %v1579_v24 = vld [vmem:[%s2760_s15] sm:$0xff] }
 0x18b   : > { %v1015_v37 = vrot.slane %v1014_v31, 2  ;;  %v1057_v57 = vsel %vm1056_vm8, %v1025_v54, %v1055_v56 }
 0x18d   : > { %v1016_v50 = vadd.f32 %v1015_v37, %v1014_v31  ;;  %v1328_v31 = vld [vmem:[%s2755_s10 + $0x18] sm:$0xff]  ;;  %v1330_v37 = vld [vmem:[%s2755_s10 + $0x28] sm:$0xff] }
 0x18e   : > { %v1962_v33 = vpack.c.bf16 %v1328_v31, %v1327_v30  ;;  %v1965_v41 = vpack.c.bf16 %v1330_v37, %v1329_v35  ;;  %v1582_v30 = vld [vmem:[%s2760_s15 + $0x18] sm:$0xff] }
 0x18f   : > { %v1017_v7 = vrot.slane %v1016_v50, 1 }
 0x191   : > { %v1018_v59 = vadd.f32 %v1017_v7, %v1016_v50  ;;  %v1333_v50 = vld [vmem:[%s2755_s10 + $0x40] sm:$0xff]  ;;  %v1335_v7 = vld [vmem:[%s2755_s10 + $0x50] sm:$0xff] }
 0x192   : > { %v1971_v1 = vpack.c.bf16 %v1334_v51, %v1333_v50  ;;  %v1974_v54 = vpack.c.bf16 %v1336_v53, %v1335_v7 }
 0x193   : > { %v1026_v47 = vmul.f32 0.0625, %v1018_v59  ;;  %v1338_v59 = vld [vmem:[%s2755_s10 + $0x68] sm:$0xff] }
 0x194   : > { %v1977_v52 = vpack.c.bf16 %v1338_v59, %v1337_v38 }
 0x195   : > { %v1059_v39 = vsel %vm1058_vm9, %v1026_v47, %v1057_v57 }
 0x196   : > { %1819 = vmatmul.mubr.msk.f32.vlgmr.msra.gmra.mrb[0].mxu0 %vm946_vm2, %v1059_v39 }
 0x197   : > { %1848 = vmatprep.mubr.msk.f32.mxu0 %vm2131_vm1, %v2132_v23  ;;  %1941 = vmatpush3.bf16.msra.mxu0 %v1940_v11 }
 0x198   : > { %1942 = vmatprep.subr.bf16.mxu0 %v2130_v20 }
 0x19b   : > { %1944 = vmatpush3.bf16.msra.mxu0 %v1943_v36 }
 0x19c   : > { %1945 = vmatprep.subr.bf16.mxu0 %v2130_v20 }
 0x19f   : > { %1947 = vmatpush3.bf16.msra.mxu0 %v1946_v15  ;;  %v1989_v15 = vpack.c.bf16 %v1501_v14, %v1500_v12 }
 0x1a0   : > { %1948 = vmatprep.subr.bf16.mxu0 %v2130_v20 }
 0x1a3   : > { %1950 = vmatpush3.bf16.msra.mxu0 %v1949_v17  ;;  %v1992_v17 = vpack.c.bf16 %v1503_v0, %v1502_v28 }
 0x1a4   : > { %1982 = vmatprep.subr.bf16.mxu0 %v2130_v20 }
 0x269   : > { %v1128_v13 = vpop.f32.mrb[0].mxu0 }
 0x26a   : > { %v1129_v48 = vadd.f32 %v1742_v19, %v1128_v13  ;;  %v1820_v55 = vpop.f32.mrb[1].mxu0 }
 0x26c   : > { %1830 = vmatmul.mubr.msk.f32.vlgmr.msra.gmra.mrb[0].mxu1 %vm946_vm2, %v1129_v48 }
 0x26d   : > { %1859 = vmatprep.mubr.msk.f32.mxu1 %vm2131_vm1, %v2132_v23  ;;  %1953 = vmatpush3.bf16.msra.mxu1 %v1952_v22 }
 0x26e   : > { %1954 = vmatprep.subr.bf16.mxu1 %v2130_v20 }
 0x271   : > { %1957 = vmatpush3.bf16.msk.msra.mxu1 %vm1956_vm13, %v1955_v40  ;;  %v1580_v40 = vld [vmem:[%s2760_s15 + $0x8] sm:$0xff] }
 0x272   : > { %1958 = vmatprep.subr.bf16.mxu1 %v2130_v20  ;;  %v1995_v26 = vpack.c.bf16 %v1580_v40, %v1579_v24 }
 0x274   : > { %1860 = vmatmul.mubr.msk.f32.vlgmr.msra.gmra.mrb[2].mxu1 %vm1345_vm14, %v1324_v27 }
 0x275   : > { %1960 = vmatpush3.bf16.msra.mxu1 %v1959_v29  ;;  %1894 = vmatprep.mubr.msk.f32.mxu1 %vm2131_vm1, %v2132_v23  ;;  %v1581_v29 = vld [vmem:[%s2760_s15 + $0x10] sm:$0xff] }
 0x276   : > { %1961 = vmatprep.subr.bf16.mxu1 %v2130_v20  ;;  %v1998_v31 = vpack.c.bf16 %v1582_v30, %v1581_v29 }
 0x279   : > { %1963 = vmatpush3.bf16.msra.mxu1 %v1962_v33  ;;  %v1504_v33 = vld [vmem:[%s2759_s14] sm:$0x1] }
 0x27a   : > { %1964 = vmatprep.subr.bf16.mxu1 %v2130_v20 }
 0x27d   : > { %1966 = vmatpush3.bf16.msra.mxu1 %v1965_v41 }
 0x27e   : > { %1967 = vmatprep.subr.bf16.mxu1 %v2130_v20 }
 0x281   : > { %1969 = vmatpush3.bf16.msra.mxu1 %v1968_v49 }
 0x282   : > { %1970 = vmatprep.subr.bf16.mxu1 %v2130_v20 }
 0x285   : > { %1972 = vmatpush3.bf16.msra.mxu1 %v1971_v1 }
 0x286   : > { %1973 = vmatprep.subr.bf16.mxu1 %v2130_v20 }
 0x289   : > { %1975 = vmatpush3.bf16.msra.mxu1 %v1974_v54 }
 0x28a   : > { %1976 = vmatprep.subr.bf16.mxu1 %v2130_v20 }
 0x28d   : > { %1978 = vmatpush3.bf16.msra.mxu1 %v1977_v52 }
 0x28e   : > { %1979 = vmatprep.subr.bf16.mxu1 %v2130_v20 }
 0x33f   : > { %v2527_v61 = vpop.f32.mrb[0].mxu1 }
 0x340   : > { %v1210_v62 = vsel %vm1209_vm10, %v2527_v61, 0.0  ;;  %v1831_v63 = vpop.f32.mrb[1].mxu1 }
 0x341   : > { %v1211_v2 = vrot.slane %v1210_v62, 4  ;;  %v1340_v63 = vld [vmem:[%s2755_s10 + $0x78] sm:$0xff] }
 0x343   : > { %v1212_v3 = vadd.f32 %v1211_v2, %v1210_v62 }
 0x345   : > { %v1213_v4 = vrot.slane %v1212_v3, 2 }
 0x347   : > { %v1214_v6 = vadd.f32 %v1213_v4, %v1212_v3  ;;  %v1496_v3 = vld [vmem:[%s2758_s13] sm:$0xff]  ;;  %v1497_v4 = vld [vmem:[%s2758_s13 + $0x8] sm:$0xff] }
 0x348   : > { %v1983_v44 = vpack.c.bf16 %v1497_v4, %v1496_v3 }
 0x349   : > { %v1215_v8 = vrot.slane %v1214_v6, 1 }
 0x34b   : > { %v1216_v10 = vadd.f32 %v1215_v8, %v1214_v6  ;;  %v1499_v6 = vld [vmem:[%s2758_s13 + $0x18] sm:$0xff]  ;;  %v1419_v8 = vpop.f32.mrb[2].mxu1 }
 0x34c   : > { %v1986_v11 = vpack.c.bf16 %v1499_v6, %v1498_v5  ;;  %v1861_v16 = vpop.f32.mrb[3].mxu1 }
 0x34d   : > { %v1218_v34 = vmul.f32 0.125, %v1216_v10 }
 0x34f   : > { %1220 = vrot.lane.b32.xlu1 %v1218_v34, %s2133_s18  ;;  %s551_s18 = scalar_lea.vmem [#allocation2], %s550_s0 }
 0x350   : > { %s1671_s22 = sshll.u32 %s551_s18, 4  ;;  %s2705_s22 = int_to_ptr.vmem [resolvable:$true] %s1671_s22 }
 0x351   : > { %s2063_s3 = scalar_lea.vmem %s2705_s22, 16  ;;  %p2070_p0 = scmp.lt.s32.totalorder %s2705_s22, %s2068_s19 }
 0x352   : > { %p2064_p11 = scmp.ne.s32.totalorder %s2705_s22, %s2063_s3  ;;  %p2071_p1 = scmp.lt.s32.totalorder %s2069_s29, %s2063_s3 }
 0x354   : > { %p2065_p12 = pnand %p2064_p11, %p2264_p5  ;;  %p2072_p2 = por %p2071_p1, %p2070_p0 }
 0x356   : > { %p2066_p13 = pneg %p2065_p12 }
 0x358   : > { %p2073_p3 = pnand %p2072_p2, %p2066_p13 }
 0x3c1   : > { %v1221_v47 = vpop.permute.xlu1 %1220 }
 0x3c2   : > { %v1223_v56 = vadd.f32 %v1221_v47, %v2527_v61  ;;  %v1339_v61 = vld [vmem:[%s2755_s10 + $0x70] sm:$0xff] }
 0x3c3   : > { %v1980_v2 = vpack.c.bf16 %v1340_v63, %v1339_v61 }
 0x3c4   : > { %v1231_v57 = vadd.f32 %v1745_v42, %v1223_v56 }
 0x3c5   : > { %1981 = vmatpush3.bf16.msra.mxu1 %v1980_v2 }
 0x3c6   : > { %v1232_v39 = vmax.f32 %v1231_v57, 0.0 }
 0x3c8   : > { %v1234_v43 = vsel %vm1233_vm15, %v1232_v39, 0.0 }
 0x3c9   : > { %v1235_v58 = vrot.slane %v1234_v43, 4 }
 0x3cb   : > { %v1236_v60 = vadd.f32 %v1235_v58, %v1234_v43 }
 0x3cd   : > { %v1237_v19 = vrot.slane %v1236_v60, 2 }
 0x3cf   : > { %v1238_v13 = vadd.f32 %v1237_v19, %v1236_v60 }
 0x3d1   : > { %v1239_v48 = vrot.slane %v1238_v13, 1 }
 0x3d3   : > { %v1240_v55 = vadd.f32 %v1239_v48, %v1238_v13 }
 0x3d5   : > { %v1241_v62 = vmul.f32 0.125, %v1240_v55 }
 0x3d7   : > { %1849 = vmatmul.mubr.msk.f32.vlgmr.msra.gmra.mrb[2].mxu0 %vm1233_vm15, %v1241_v62 }
 0x3d8   : > { %1913 = vmatprep.mubr.msk.f32.mxu0 %vm2131_vm1, %v2132_v23  ;;  %1984 = vmatpush3.bf16.msra.mxu0 %v1983_v44 }
 0x3d9   : > { %1985 = vmatprep.subr.bf16.mxu0 %v2130_v20 }
 0x3dc   : > { %1987 = vmatpush3.bf16.msra.mxu0 %v1986_v11 }
 0x3dd   : > { %1988 = vmatprep.subr.bf16.mxu0 %v2130_v20 }
 0x3e0   : > { %1990 = vmatpush3.bf16.msra.mxu0 %v1989_v15 }
 0x3e1   : > { %1991 = vmatprep.subr.bf16.mxu0 %v2130_v20 }
 0x3e4   : > { %1993 = vmatpush3.bf16.msra.mxu0 %v1992_v17 }
 0x3e5   : > { %1994 = vmatprep.subr.bf16.mxu0 %v2130_v20 }
 0x4aa   : > { %v1320_v10 = vpop.f32.mrb[2].mxu0 }
 0x4ab   : > { %v1321_v36 = vadd.f32 %v1320_v10, %v1250_v9  ;;  %v1850_v34 = vpop.f32.mrb[3].mxu0 }
 0x4ad   : > { %1895 = vmatmul.mubr.f32.vlgmr.msra.gmra.mrb[4].mxu1 %v1321_v36 }
 0x580   : > { %v1489_v18 = vpop.f32.mrb[4].mxu1 }
 0x581   : > { %v1490_v21 = vadd.f32 %v1489_v18, %v1419_v8  ;;  %v1896_v22 = vpop.f32.mrb[5].mxu1 }
 0x583   : > { %v1494_v25 = vadd.f32 %v1493_v32, %v1490_v21 }
 0x585   : > { %v1495_v27 = vmax.f32 %v1494_v25, 0.0 }
 0x587   : > { %1914 = vmatmul.mubr.msk.f32.vlgmr.msra.gmra.mrb[4].mxu0 %vm1233_vm15, %v1495_v27 }
 0x588   : > { %1996 = vmatpush3.bf16.msra.mxu0 %v1995_v26  ;;  %1924 = vmatprep.mubr.msk.f32.mxu0 %vm2131_vm1, %v2132_v23 }
 0x589   : > { %1997 = vmatprep.subr.bf16.mxu0 %v2130_v20  ;;  %v1583_v20 = vld [vmem:[%s2761_s16] sm:$0x1] }
 0x58c   : > { %1999 = vmatpush3.bf16.msra.mxu0 %v1998_v31 }
 0x65a   : > { %v1574_v35 = vpop.f32.mrb[4].mxu0 }
 0x65b   : > { %v1575_v37 = vadd.f32 %v1574_v35, %v1504_v33  ;;  %v1915_v41 = vpop.f32.mrb[5].mxu0 }
 0x65d   : > { %v1578_v23 = vmax.f32 %v1575_v37, 0.0 }
 0x65f   : > { %1925 = vmatmul.mubr.msk.f32.vlgmr.msra.gmra.mrb[6].mxu0 %vm946_vm2, %v1578_v23 }
 0x732   : > { %v1653_v45 = vpop.f32.mrb[6].mxu0 }
 0x733   : > { %v1654_v46 = vadd.f32 %v1653_v45, %v1583_v20  ;;  %v1926_v49 = vpop.f32.mrb[7].mxu0 }
 0x735   : > { %1657 = vst [vmem:[%s551_s18] sm:$0x1] %v1654_v46 }
 0x736   : > { %2076 = shalt.err (!%p2073_p3)
}
 0x737   : > { %s2077_s0 = scalar_lea.hbm %s2703_s26, 16  ;;  %s2081_s23 = scalar_lea.hbm %s2762_s17, 32 }
 0x738   : > { %p2078_p4 = scmp.ne.s32.totalorder %s2703_s26, %s2077_s0  ;;  %p2082_p9 = scmp.lt.u32.totalorder %s2703_s26, %s2762_s17 }
 0x739   : > { %p2083_p10 = scmp.lt.u32.totalorder %s2081_s23, %s2077_s0  ;;  %p2085_p12 = scmp.lt.u32.totalorder %s2077_s0, %s2703_s26 }
 0x73a   : > { %p2079_p7 = pnand %p2078_p4, %p2264_p5 }
 0x73b   : > { %p2084_p11 = por %p2083_p10, %p2082_p9 }
 0x73c   : > { %p2080_p8 = pneg %p2079_p7 }
 0x73d   : > { %p2086_p13 = por %p2085_p12, %p2084_p11 }
 0x73f   : > { %p2087_p0 = pnand %p2086_p13, %p2080_p8 }
 0x741   : > { %2090 = shalt.err (!%p2087_p0)
}
 0x742   : > { %2000 = dma.vmem_to_hbm [thread:$0]  (%p2264_p5), %s2705_s22, 16, %s2703_s26, %s1659_s21  }
 0x743 PF: > { %p2006_p1 = scmp.ge.s32.totalorder %s2125_s27, 2  ;;  %s1683_s3 = sand.u32 1, %s2113_s24  }
 0x744   : > { %s1684_s19 = scalar_lea.sflag [#allocation3], %s1683_s3 }
 0x745   : > { %p2003_p2 = pnand %p2006_p1, %p2268_p6 }
 0x747   : > { %2108 = dma.done.wait (!%p2003_p2), %s1684_s19, 16  }
 0x748   : > { %2110 = vsyncadd (!%p2003_p2), %s1684_s19, 4294967280  ;;  %s2779_s27 = sld [smem:[#allocation6_spill]]  ;;  %s2780_s29 = sld [smem:[#allocation5_spill]] }
 0x749   : > { %s2781_s26 = sld [smem:[#allocation7_spill]]  ;;  %s2782_s24 = smov %s2117_s25 }
 0x74e   : > { %p27_p3 = scmp.ge.s32.totalorder %s2779_s27, 4   ;;  %s2783_s25 = smov %s2780_s29 }
 0x750   :  { %29 = sbr.rel (!%p27_p3) target bundleno = 8 (0x8), region = 126 }
 0x757   :  { %1688 = vsyncpa [#allocation3], 1 }
 0x758   :  { %1690 = vsyncpa [#allocation3 + $0x1], 1 }

</bundles_post_ra>
